<compile_context>
chip_gen: v6e
topology: v6e:2x2x1
jax: 0.10.0
libtpu: 0.0.40
codegen_flags: <defaults>
</compile_context>

<pallas_src>
import math
import jax
import jax.numpy as jnp
from jax.experimental import pallas as pl
from jax.experimental.pallas import tpu as pltpu


def _round_up(x, m):
    return ((x + m - 1) // m) * m


def _gelu_tanh(x):
    # PyTorch nn.GELU(approximate='tanh')
    c = math.sqrt(2.0 / math.pi)
    return 0.5 * x * (1.0 + jnp.tanh(c * (x + 0.044715 * x * x * x)))


def mlp_kernel(x_ref, w1_ref, b1_ref, gamma_ref, beta_ref, w2_ref, b2_ref, o_ref):
    # fc1 on the MXU: bf16 operands, f32 accumulation.
    x = x_ref[...].astype(jnp.bfloat16)                         # (tm, D_in)
    h = jnp.dot(x, w1_ref[...], preferred_element_type=jnp.float32) + b1_ref[...]

    # GELU(tanh) in f32 (VPU + EUP).
    h = _gelu_tanh(h)

    # drop1: identity (eval mode)

    # LayerNorm over hidden dim (eps = 1e-5, nn.LayerNorm default), affine folded.
    mean = jnp.mean(h, axis=-1, keepdims=True)
    centered = h - mean
    var = jnp.mean(centered * centered, axis=-1, keepdims=True)
    inv = jax.lax.rsqrt(var + 1e-5)
    h = centered * (inv * gamma_ref[...]) + beta_ref[...]

    # fc2 on the MXU: bf16 operands, f32 accumulation.
    out = jnp.dot(h.astype(jnp.bfloat16), w2_ref[...],
                  preferred_element_type=jnp.float32) + b2_ref[...]

    # drop2: identity (eval mode)
    o_ref[...] = out.astype(o_ref.dtype)


def attention_perceptron(x, params, *, tm=256):
    """x: (B, T, in_features) float32. Returns (B, T, out_features)."""
    w1, b1, gamma, beta, w2, b2 = params
    B, T, d_in = x.shape
    d_hidden = w1.shape[1]
    d_out = w2.shape[1]
    M = B * T

    # Weights go to the MXU as bf16 (also halves their HBM traffic).
    # Biases / LayerNorm affine stay f32 for the VPU path.
    w1_b = w1.astype(jnp.bfloat16)
    w2_b = w2.astype(jnp.bfloat16)

    # Row tile: as large as requested, multiple of 8 (sublane), never bigger
    # than the (rounded-up) problem. If that would leave a single grid step,
    # halve it once so both v7x TensorCores get work from the "parallel" axis.
    tm_eff = min(tm, _round_up(M, 8))
    if _round_up(M, tm_eff) // tm_eff < 2 and tm_eff >= 16:
        tm_eff = _round_up(tm_eff // 2, 8)

    # Pad rows up to a multiple of the tile (ragged M path); slice off below.
    Mp = _round_up(M, tm_eff)
    x2 = x.reshape(M, d_in)
    if Mp != M:
        x2 = jnp.pad(x2, ((0, Mp - M), (0, 0)))
    grid = Mp // tm_eff

    # Explicit VMEM budget (v7x has only 64 MiB physical / 32 MiB default scoped).
    itm = x.dtype.itemsize
    vmem_est = (
        2 * tm_eff * d_in * itm                       # double-buffered x tile
        + 2 * tm_eff * d_out * itm                    # double-buffered out tile
        + 2 * (d_in * d_hidden + d_hidden * d_out) * 2  # bf16 W1/W2 (budget 2x)
        + 2 * (3 * d_hidden + d_out) * 4              # biases + LN affine
        + 3 * tm_eff * d_hidden * 4                   # f32 hidden activation temps
    )
    vmem_limit = min(100 * 1024 * 1024,
                     max(32 * 1024 * 1024, int(1.5 * vmem_est)))

    out = pl.pallas_call(
        mlp_kernel,
        out_shape=jax.ShapeDtypeStruct((Mp, d_out), x.dtype),
        grid_spec=pltpu.PrefetchScalarGridSpec(
            num_scalar_prefetch=0,
            grid=(grid,),
            in_specs=[
                pl.BlockSpec((tm_eff, d_in), lambda i: (i, 0)),     # x tile
                pl.BlockSpec((d_in, d_hidden), lambda i: (0, 0)),   # W1 (bf16)
                pl.BlockSpec((1, d_hidden), lambda i: (0, 0)),      # b1
                pl.BlockSpec((1, d_hidden), lambda i: (0, 0)),      # LN gamma
                pl.BlockSpec((1, d_hidden), lambda i: (0, 0)),      # LN beta
                pl.BlockSpec((d_hidden, d_out), lambda i: (0, 0)),  # W2 (bf16)
                pl.BlockSpec((1, d_out), lambda i: (0, 0)),         # b2
            ],
            out_specs=pl.BlockSpec((tm_eff, d_out), lambda i: (i, 0)),
        ),
        compiler_params=pltpu.CompilerParams(
            dimension_semantics=("parallel",),
            vmem_limit_bytes=vmem_limit),
    )(x2, w1_b, b1, gamma, beta, w2_b, b2)

    return out[:M].reshape(B, T, d_out)


def reference(x, params):
    """Matches the kernel's math (bf16 matmul operands, f32 accumulation)."""
    w1, b1, gamma, beta, w2, b2 = params
    h = jnp.dot(x.astype(jnp.bfloat16), w1.astype(jnp.bfloat16),
                preferred_element_type=jnp.float32) + b1
    h = _gelu_tanh(h)
    mean = jnp.mean(h, axis=-1, keepdims=True)
    var = jnp.mean((h - mean) ** 2, axis=-1, keepdims=True)
    h = (h - mean) * jax.lax.rsqrt(var + 1e-5) * gamma + beta
    return jnp.dot(h.astype(jnp.bfloat16), w2.astype(jnp.bfloat16),
                   preferred_element_type=jnp.float32) + b2


def _make_params(key, in_features, hidden_features, out_features):
    k1, kb1, k2, kb2, kg, kb = jax.random.split(key, 6)
    lim1 = 1.0 / math.sqrt(in_features)
    lim2 = 1.0 / math.sqrt(hidden_features)
    w1 = jax.random.uniform(k1, (in_features, hidden_features), jnp.float32, -lim1, lim1)
    b1 = jax.random.uniform(kb1, (1, hidden_features), jnp.float32, -lim1, lim1)
    w2 = jax.random.uniform(k2, (hidden_features, out_features), jnp.float32, -lim2, lim2)
    b2 = jax.random.uniform(kb2, (1, out_features), jnp.float32, -lim2, lim2)
    # LayerNorm affine (PyTorch init: ones / zeros; perturb slightly to exercise path)
    gamma = jnp.ones((1, hidden_features), jnp.float32) \
        + 0.01 * jax.random.normal(kg, (1, hidden_features))
    beta = jnp.zeros((1, hidden_features), jnp.float32) \
        + 0.01 * jax.random.normal(kb, (1, hidden_features))
    return (w1, b1, gamma, beta, w2, b2)


if __name__ == "__main__":
    # Small shapes consistent with the module ([batch, tokens, hidden dim]),
    # but with lane-dense (multiple-of-128) feature dims per the perf review.
    in_features, hidden_features, out_features = 128, 512, 128   # mlp_ratio = 4

    key = jax.random.PRNGKey(0)
    kp, kx1, kx2 = jax.random.split(key, 3)
    params = _make_params(kp, in_features, hidden_features, out_features)

    # Case 1: tiny (B=2, T=8) — exercises the small-M / tile-shrink path.
    B, T = 2, 8
    x = jax.random.normal(kx1, (B, T, in_features), dtype=jnp.float32)
    out = jax.block_until_ready(attention_perceptron(x, params))
    ref = reference(x, params)
    assert out.shape == (B, T, out_features)
    assert jnp.allclose(out, ref, atol=2e-2, rtol=2e-2), "mismatch vs reference (small)"

    # Case 2: ragged M with the big (tm=256) tile + padding path.
    B2, T2 = 2, 260
    x2 = jax.random.normal(kx2, (B2, T2, in_features), dtype=jnp.float32)
    out2 = jax.block_until_ready(attention_perceptron(x2, params, tm=256))
    ref2 = reference(x2, params)
    assert out2.shape == (B2, T2, out_features)
    assert jnp.allclose(out2, ref2, atol=2e-2, rtol=2e-2), "mismatch vs reference (ragged)"

    print("KERNEL_OK")
</pallas_src>

<mosaic_0001>
module attributes {stable_mosaic.version = 11 : i64} {
  func.func @mlp_kernel(%arg0: i32, %arg1: memref<8x128xf32, #tpu.memory_space<vmem>>, %arg2: memref<128x512xbf16, #tpu.memory_space<vmem>>, %arg3: memref<1x512xf32, #tpu.memory_space<vmem>>, %arg4: memref<1x512xf32, #tpu.memory_space<vmem>>, %arg5: memref<1x512xf32, #tpu.memory_space<vmem>>, %arg6: memref<512x128xbf16, #tpu.memory_space<vmem>>, %arg7: memref<1x128xf32, #tpu.memory_space<vmem>>, %arg8: memref<8x128xf32, #tpu.memory_space<vmem>>) attributes {dimension_semantics = [#tpu.dimension_semantics<parallel>], iteration_bounds = array<i64: 2>, scalar_prefetch = 0 : i64, scratch_operands = 0 : i64, tpu.core_type = #tpu.core_type<tc>, window_params = [{transform_indices = @transform_0, window_bounds = array<i64: 8, 128>}, {pipeline_mode = #tpu.pipeline_mode<synchronous>, transform_indices = @transform_1, window_bounds = array<i64: 128, 512>}, {pipeline_mode = #tpu.pipeline_mode<synchronous>, transform_indices = @transform_2, window_bounds = array<i64: 1, 512>}, {pipeline_mode = #tpu.pipeline_mode<synchronous>, transform_indices = @transform_3, window_bounds = array<i64: 1, 512>}, {pipeline_mode = #tpu.pipeline_mode<synchronous>, transform_indices = @transform_4, window_bounds = array<i64: 1, 512>}, {pipeline_mode = #tpu.pipeline_mode<synchronous>, transform_indices = @transform_5, window_bounds = array<i64: 512, 128>}, {pipeline_mode = #tpu.pipeline_mode<synchronous>, transform_indices = @transform_6, window_bounds = array<i64: 1, 128>}, {transform_indices = @transform_7, window_bounds = array<i64: 8, 128>}]} {
    %c0 = arith.constant 0 : index
    %c0_0 = arith.constant 0 : index
    %0 = vector.load %arg1[%c0, %c0_0] : memref<8x128xf32, #tpu.memory_space<vmem>>, vector<8x128xf32>
    %1 = arith.truncf %0 : vector<8x128xf32> to vector<8x128xbf16>
    %c0_1 = arith.constant 0 : index
    %c0_2 = arith.constant 0 : index
    %2 = vector.load %arg2[%c0_1, %c0_2] : memref<128x512xbf16, #tpu.memory_space<vmem>>, vector<128x512xbf16>
    %cst = arith.constant dense<0.000000e+00> : vector<8x512xf32>
    %3 = tpu.matmul %1, %2, %cst {dimension_numbers = #tpu.dot_dimension_numbers<[1], [0], [0], [1], [0, 0, 1, 1], [], []>} : vector<8x128xbf16>, vector<128x512xbf16>, vector<8x512xf32> -> vector<8x512xf32>
    %c0_3 = arith.constant 0 : index
    %c0_4 = arith.constant 0 : index
    %4 = vector.load %arg3[%c0_3, %c0_4] : memref<1x512xf32, #tpu.memory_space<vmem>>, vector<1x512xf32>
    %5 = vector.broadcast %4 : vector<1x512xf32> to vector<8x512xf32>
    %6 = arith.addf %3, %5 : vector<8x512xf32>
    %cst_5 = arith.constant 5.000000e-01 : f32
    %7 = vector.broadcast %cst_5 : f32 to vector<8x512xf32>
    %8 = arith.mulf %7, %6 : vector<8x512xf32>
    %cst_6 = arith.constant 4.471500e-02 : f32
    %9 = vector.broadcast %cst_6 : f32 to vector<8x512xf32>
    %10 = arith.mulf %9, %6 : vector<8x512xf32>
    %11 = arith.mulf %10, %6 : vector<8x512xf32>
    %12 = arith.mulf %11, %6 : vector<8x512xf32>
    %13 = arith.addf %6, %12 : vector<8x512xf32>
    %cst_7 = arith.constant 0.797884583 : f32
    %14 = vector.broadcast %cst_7 : f32 to vector<8x512xf32>
    %15 = arith.mulf %14, %13 : vector<8x512xf32>
    %16 = math.tanh %15 : vector<8x512xf32>
    %cst_8 = arith.constant 1.000000e+00 : f32
    %17 = vector.broadcast %cst_8 : f32 to vector<8x512xf32>
    %18 = arith.addf %17, %16 : vector<8x512xf32>
    %19 = arith.mulf %8, %18 : vector<8x512xf32>
    %cst_9 = arith.constant dense<0.000000e+00> : vector<8xf32>
    %20 = vector.multi_reduction <add>, %19, %cst_9 [1] : vector<8x512xf32> to vector<8xf32>
    %21 = vector.shape_cast %20 : vector<8xf32> to vector<8x1xf32>
    %cst_10 = arith.constant 5.120000e+02 : f32
    %22 = vector.broadcast %cst_10 : f32 to vector<8x1xf32>
    %23 = arith.divf %21, %22 : vector<8x1xf32>
    %24 = vector.broadcast %23 : vector<8x1xf32> to vector<8x512xf32>
    %25 = arith.subf %19, %24 : vector<8x512xf32>
    %26 = arith.mulf %25, %25 : vector<8x512xf32>
    %cst_11 = arith.constant dense<0.000000e+00> : vector<8xf32>
    %27 = vector.multi_reduction <add>, %26, %cst_11 [1] : vector<8x512xf32> to vector<8xf32>
    %28 = vector.shape_cast %27 : vector<8xf32> to vector<8x1xf32>
    %cst_12 = arith.constant 5.120000e+02 : f32
    %29 = vector.broadcast %cst_12 : f32 to vector<8x1xf32>
    %30 = arith.divf %28, %29 : vector<8x1xf32>
    %cst_13 = arith.constant 9.99999974E-6 : f32
    %31 = vector.broadcast %cst_13 : f32 to vector<8x1xf32>
    %32 = arith.addf %30, %31 : vector<8x1xf32>
    %33 = math.rsqrt %32 : vector<8x1xf32>
    %c0_14 = arith.constant 0 : index
    %c0_15 = arith.constant 0 : index
    %34 = vector.load %arg4[%c0_14, %c0_15] : memref<1x512xf32, #tpu.memory_space<vmem>>, vector<1x512xf32>
    %35 = vector.broadcast %33 : vector<8x1xf32> to vector<8x512xf32>
    %36 = vector.broadcast %34 : vector<1x512xf32> to vector<8x512xf32>
    %37 = arith.mulf %35, %36 : vector<8x512xf32>
    %38 = arith.mulf %25, %37 : vector<8x512xf32>
    %c0_16 = arith.constant 0 : index
    %c0_17 = arith.constant 0 : index
    %39 = vector.load %arg5[%c0_16, %c0_17] : memref<1x512xf32, #tpu.memory_space<vmem>>, vector<1x512xf32>
    %40 = vector.broadcast %39 : vector<1x512xf32> to vector<8x512xf32>
    %41 = arith.addf %38, %40 : vector<8x512xf32>
    %42 = arith.truncf %41 : vector<8x512xf32> to vector<8x512xbf16>
    %c0_18 = arith.constant 0 : index
    %c0_19 = arith.constant 0 : index
    %43 = vector.load %arg6[%c0_18, %c0_19] : memref<512x128xbf16, #tpu.memory_space<vmem>>, vector<512x128xbf16>
    %cst_20 = arith.constant dense<0.000000e+00> : vector<8x128xf32>
    %44 = tpu.matmul %42, %43, %cst_20 {dimension_numbers = #tpu.dot_dimension_numbers<[1], [0], [0], [1], [0, 0, 1, 1], [], []>} : vector<8x512xbf16>, vector<512x128xbf16>, vector<8x128xf32> -> vector<8x128xf32>
    %c0_21 = arith.constant 0 : index
    %c0_22 = arith.constant 0 : index
    %45 = vector.load %arg7[%c0_21, %c0_22] : memref<1x128xf32, #tpu.memory_space<vmem>>, vector<1x128xf32>
    %46 = vector.broadcast %45 : vector<1x128xf32> to vector<8x128xf32>
    %47 = arith.addf %44, %46 : vector<8x128xf32>
    %c0_23 = arith.constant 0 : index
    %c0_24 = arith.constant 0 : index
    %48 = vector.load %arg8[%c0_23, %c0_24] : memref<8x128xf32, #tpu.memory_space<vmem>>, vector<8x128xf32>
    tpu.vector_store %arg8[%c0_23, %c0_24], %47 {strides = array<i32>} : memref<8x128xf32, #tpu.memory_space<vmem>>, vector<8x128xf32>,
    return
  }
  func.func @transform_0(%arg0: i32) -> (i32, i32) {
    %c0_i32 = arith.constant 0 : i32
    %c0_i32_0 = arith.constant 0 : i32
    return %arg0, %c0_i32 : i32, i32
  }
  func.func @transform_1(%arg0: i32) -> (i32, i32) {
    %c0_i32 = arith.constant 0 : i32
    %c0_i32_0 = arith.constant 0 : i32
    %c0_i32_1 = arith.constant 0 : i32
    return %c0_i32, %c0_i32_0 : i32, i32
  }
  func.func @transform_2(%arg0: i32) -> (i32, i32) {
    %c0_i32 = arith.constant 0 : i32
    %c0_i32_0 = arith.constant 0 : i32
    %c0_i32_1 = arith.constant 0 : i32
    return %c0_i32, %c0_i32_0 : i32, i32
  }
  func.func @transform_3(%arg0: i32) -> (i32, i32) {
    %c0_i32 = arith.constant 0 : i32
    %c0_i32_0 = arith.constant 0 : i32
    %c0_i32_1 = arith.constant 0 : i32
    return %c0_i32, %c0_i32_0 : i32, i32
  }
  func.func @transform_4(%arg0: i32) -> (i32, i32) {
    %c0_i32 = arith.constant 0 : i32
    %c0_i32_0 = arith.constant 0 : i32
    %c0_i32_1 = arith.constant 0 : i32
    return %c0_i32, %c0_i32_0 : i32, i32
  }
  func.func @transform_5(%arg0: i32) -> (i32, i32) {
    %c0_i32 = arith.constant 0 : i32
    %c0_i32_0 = arith.constant 0 : i32
    %c0_i32_1 = arith.constant 0 : i32
    return %c0_i32, %c0_i32_0 : i32, i32
  }
  func.func @transform_6(%arg0: i32) -> (i32, i32) {
    %c0_i32 = arith.constant 0 : i32
    %c0_i32_0 = arith.constant 0 : i32
    %c0_i32_1 = arith.constant 0 : i32
    return %c0_i32, %c0_i32_0 : i32, i32
  }
  func.func @transform_7(%arg0: i32) -> (i32, i32) {
    %c0_i32 = arith.constant 0 : i32
    %c0_i32_0 = arith.constant 0 : i32
    return %arg0, %c0_i32 : i32, i32
  }
}

</mosaic_0001>

<bundles_post_ra>
// kernel: tpu_custom_call.1
= control target key start
LH: loop header
LB: loop body
LE: loop exit
PB: predicated region body
PF: predicated region fallthrough
CT: control target
= control target key end

     0   :  { %s2049_s0 = inlined_call_operand.hbm [shape: f32[16,128], index: 0, kind: input, shape index: {}]   ;;  %s2050_s1 = inlined_call_operand.hbm [shape: bf16[128,512], index: 1, kind: input, shape index: {}]   ;;  %s2051_s2 = inlined_call_operand.hbm [shape: f32[1,512], index: 2, kind: input, shape index: {}]   ;;  %s2052_s3 = inlined_call_operand.vmem [shape: f32[1,512], index: 3, kind: input, shape index: {}]   ;;  %s2053_s4 = inlined_call_operand.hbm [shape: f32[1,512], index: 4, kind: input, shape index: {}]   ;;  %s2054_s5 = inlined_call_operand.hbm [shape: bf16[512,128], index: 5, kind: input, shape index: {}]   ;;  %s2055_s6 = inlined_call_operand.vmem [shape: f32[1,128], index: 6, kind: input, shape index: {}]   ;;  %s2056_s7 = inlined_call_operand.hbm [shape: f32[16,128], index: 7, kind: output, shape index: {}]  }
   0x1   :  { %2061 = sst [smem:[#allocation16_spill]] %s2050_s1 }
   0x2   :  { %2062 = sst [smem:[#allocation17_spill]] %s2051_s2 }
   0x3   :  { %12 = vsyncpa [#allocation3], 0 }
   0x4   :  { %14 = vsyncpa [#allocation3 + $0x1], 0 }
   0x5   :  { %15 = vsyncpa [#allocation6], 0 }
   0x6   :  { %16 = vsyncpa [#allocation9], 0 }
   0x7   :  { %17 = vsyncpa [#allocation4], 0 }
   0x8   :  { %19 = vsyncpa [#allocation4 + $0x1], 0  ;;  %s1800_s24 = smov 0   ;;  %s1802_s25 = smov 0  }
   0x9   :  { %s1804_s26 = smov 0   ;;  %s1806_s27 = smov 0  }
   0xa LB: > { %s1749_s28 = smov [#allocation5]   ;;  %s1821_s30 = sadd.s32 4294967295, %s1747_s27   ;;  %s1747_s27 = sphi %s1806_s27, %s2084_s27   ;;  %s1743_s26 = sphi %s1804_s26, %s2083_s26   ;;  %s1739_s25 = sphi %s1802_s25, %s2082_s25   ;;  %s1735_s24 = sphi %s1800_s24, %s2081_s24  }
   0xb   : > { %s220_s29 = sshll.u32 %s1749_s28, 4  ;;  %p1233_p0 = scmp.ge.s32.totalorder %s1747_s27, 1  ;;  %s221_s29 = int_to_ptr.vmem [resolvable:$true] %s220_s29 }
   0xc   : > { %p2057_p1 = scmp.eq.s32.totalorder %s1821_s30, 0  ;;  %p208_p2 = scmp.lt.s32.totalorder %s1747_s27, 3 }
   0xd   : > { %s1750_s9 = smov [#allocation8]   ;;  %s1751_s12 = smov [#allocation7]  }
   0xe   : > { %p1826_p3 = pnand %p1233_p0, %p208_p2  ;;  %s248_s10 = sshll.u32 %s1750_s9, 4  ;;  %s249_s10 = int_to_ptr.vmem [resolvable:$true] %s248_s10 }
   0xf   : > { %s234_s13 = sshll.u32 %s1751_s12, 4  ;;  %s1554_s14 = scalar_lea.vmem %s221_s29, 4096  ;;  %s1839_s13 = int_to_ptr.vmem [resolvable:$true] %s234_s13 }
  0x10   : > { %s2063_s8 = scalar_select %p1826_p3, 1, 0 }
  0x11   : > { %p1381_p5 = pneg %p1826_p3  ;;  %p1555_p8 = scmp.ne.s32.totalorder %s221_s29, %s1554_s14 }
  0x12   : > { %p1562_p11 = scmp.lt.s32.totalorder %s221_s29, %s221_s29  ;;  %p1563_p12 = scmp.lt.s32.totalorder %s1554_s14, %s1554_s14 }
  0x13   : > { %p1835_p6 = pnand %p1381_p5, %p2057_p1 }
  0x14   : > { %p1564_p13 = por %p1563_p12, %p1562_p11 }
  0x15   : > { %p1545_p7 = pneg %p1835_p6 }
  0x17   : > { %p1557_p9 = pnand %p1555_p8, %p1545_p7 }
  0x19   : > { %p1558_p10 = pneg %p1557_p9 }
  0x1b   : > { %p1565_p0 = pnand %p1564_p13, %p1558_p10 }
  0x1d   : > { %1568 = shalt.err (!%p1565_p0)
}
  0x1e   : > { %s1752_s15 = smov 256   ;;  %s1753_s16 = smov 16  }
  0x1f   : > { %s2065_s1 = sld [smem:[#allocation16_spill]]  ;;  %s1580_s19 = scalar_lea.vmem %s249_s10, 64 }
  0x20   : > { %p1581_p2 = scmp.ne.s32.totalorder %s249_s10, %s1580_s19  ;;  %p1588_p9 = scmp.lt.s32.totalorder %s249_s10, %s249_s10 }
  0x21   : > { %p1589_p4 = scmp.lt.s32.totalorder %s1580_s19, %s1580_s19 }
  0x22   : > { %p1583_p5 = pnand %p1581_p2, %p1545_p7 }
  0x23   : > { %p1590_p11 = por %p1589_p4, %p1588_p9 }
  0x24   : > { %p1584_p8 = pneg %p1583_p5 }
  0x25   : > { %1384 = dma.hbm_to_vmem [thread:$0]  (!%p1835_p6), %s2065_s1, 4096, %s221_s29, [#allocation6], %s1752_s15, %s1752_s15, %s1753_s16  }
  0x26   : > { %p1591_p10 = pnand %p1590_p11, %p1584_p8 }
  0x28   : > { %1594 = shalt.err (!%p1591_p10)
}
  0x29   : > { %1390 = dma.hbm_to_vmem [thread:$0]  (!%p1835_p6), %s2053_s4, 64, %s249_s10, [#allocation9]  }
  0x2a   : > { %s1606_s22 = scalar_lea.vmem %s1839_s13, 64  ;;  %p1614_p4 = scmp.lt.s32.totalorder %s1839_s13, %s1839_s13 }
  0x2b   : > { %p1607_p12 = scmp.ne.s32.totalorder %s1839_s13, %s1606_s22  ;;  %p1615_p2 = scmp.lt.s32.totalorder %s1606_s22, %s1606_s22 }
  0x2d   : > { %p1609_p13 = pnand %p1607_p12, %p1545_p7  ;;  %p1616_p5 = por %p1615_p2, %p1614_p4 }
  0x2f   : > { %p1610_p0 = pneg %p1609_p13 }
  0x31   : > { %p1617_p8 = pnand %p1616_p5, %p1610_p0 }
  0x33   : > { %1620 = shalt.err (!%p1617_p8)
}
  0x34   : > { %s2066_s2 = sld [smem:[#allocation17_spill]]  ;;  %s1754_s29 = smov [#allocation10]  }
  0x35   : > { %s258_s9 = sshll.u32 %s1754_s29, 4  ;;  %s259_s9 = int_to_ptr.vmem [resolvable:$true] %s258_s9 }
  0x36   : > { %s1632_s10 = scalar_lea.vmem %s259_s9, 4096  ;;  %p1640_p12 = scmp.lt.s32.totalorder %s259_s9, %s259_s9 }
  0x37   : > { %p1633_p9 = scmp.ne.s32.totalorder %s259_s9, %s1632_s10  ;;  %p1641_p13 = scmp.lt.s32.totalorder %s1632_s10, %s1632_s10 }
  0x39   : > { %p1635_p11 = pnand %p1633_p9, %p1545_p7  ;;  %p1642_p0 = por %p1641_p13, %p1640_p12 }
  0x3a   : > { %1387 = dma.hbm_to_vmem [thread:$0]  (!%p1835_p6), %s2066_s2, 64, %s1839_s13, [#allocation6]  }
  0x3b   : > { %p1636_p10 = pneg %p1635_p11 }
  0x3d   : > { %p1643_p4 = pnand %p1642_p0, %p1636_p10 }
  0x3f   : > { %1646 = shalt.err (!%p1643_p4)
}
  0x40   : > { %s1755_s12 = smov 64   ;;  %s1756_s13 = smov 4  }
  0x41   : > { %1393 = dma.hbm_to_vmem [thread:$0]  (!%p1835_p6), %s2054_s5, 4096, %s259_s9, [#allocation9], %s1755_s12, %s1755_s12, %s1756_s13  }
  0x42   : > { %s1232_s16 = sadd.s32 4294967294, %s1747_s27   ;;  %s1882_s17 = sadd.s32 1, %s1747_s27  }
  0x43   : > { %s29_s18 = ssub.s32 %s1747_s27, %s1882_s17  ;;  %s32_s19 = sadd.s32 1, %s1743_s26 }
  0x44   : > { %p30_p7 = scmp.eq.s32.totalorder %s29_s18, 0  ;;  %p39_p2 = scmp.ne.s32.totalorder %s1743_s26, %s1739_s25 }
  0x45   : > { %p40_p5 = scmp.eq.s32.totalorder %s1747_s27, 0  ;;  %p45_p8 = scmp.ne.s32.totalorder %s1739_s25, %s1735_s24 }
  0x46   : > { %s1893_s20 = scalar_select %p30_p7, %s1743_s26, %s32_s19  }
  0x47   : > { %p1895_p9 = por %p40_p5, %p39_p2  ;;  %p1901_p6 = por %p2057_p1, %p45_p8 }
  0x48   : > { %p195_p11 = scmp.eq.s32.totalorder %s1821_s30, 1  ;;  %p201_p10 = scmp.eq.s32.totalorder %s1232_s16, 1 }
  0x49   : > { %s2068_s21 = scalar_select %p1901_p6, 1, 0 }
  0x4a   : > { %p1406_p12 = scmp.lt.s32.totalorder %s1747_s27, 2  ;;  %s275_s22 = sand.u32 1, %s1743_s26  }
  0x4b   : > { %p1908_p13 = por %p195_p11, %p39_p2  ;;  %p1912_p0 = por %p201_p10, %p45_p8 }
  0x4c   : > { %s1239_s29 = sshll.u32 %s275_s22, 3  ;;  %s1240_s9 = sshll.u32 %s1747_s27, 7 }
  0x4d   : > { %s2069_s23 = scalar_select %p1908_p13, 1, 0 }
  0x4e   : > { %s2070_s28 = scalar_select %p1912_p0, 1, 0 }
  0x4f   : > { %s1920_s13 = scalar_lea.hbm %s2049_s0, %s1240_s9  ;;  %s279_s14 = scalar_lea.vmem [#allocation2], %s1239_s29 }
  0x50   : > { %s286_s15 = sshll.u32 %s279_s14, 4  ;;  %p1924_p4 = pnand %p1406_p12, %p1895_p9  ;;  %s287_s15 = int_to_ptr.vmem [resolvable:$true] %s286_s15 }
  0x51   : > { %s276_s18 = scalar_lea.sflag [#allocation3], %s275_s22  ;;  %s1647_s19 = scalar_lea.hbm %s1920_s13, 128 }
  0x52   : > { %p1648_p7 = scmp.ne.s32.totalorder %s1920_s13, %s1647_s19  ;;  %p1649_p2 = pneg %p1924_p4 }
  0x53   : > { %s1652_s12 = scalar_lea.hbm %s2049_s0, 256  ;;  %p1653_p11 = scmp.lt.s32.totalorder %s1920_s13, %s2049_s0 }
  0x54   : > { %p1650_p5 = pnand %p1649_p2, %p1648_p7  ;;  %p1654_p9 = scmp.lt.s32.totalorder %s1652_s12, %s1647_s19 }
  0x56   : > { %p1651_p8 = pneg %p1650_p5  ;;  %p1655_p10 = por %p1654_p9, %p1653_p11 }
  0x58   : > { %p1656_p12 = pnand %p1655_p10, %p1651_p8 }
  0x5a   : > { %1659 = shalt.err (!%p1656_p12)
}
  0x5b   : > { %s1660_s11 = scalar_lea.vmem %s287_s15, 128  ;;  %s1757_s22 = smov [#allocation2]  }
  0x5c   : > { %p1661_p1 = scmp.ne.s32.totalorder %s287_s15, %s1660_s11  ;;  %s1665_s1 = sshll.u32 %s1757_s22, 4  ;;  %s1666_s1 = int_to_ptr.vmem [resolvable:$false] %s1665_s1 }
  0x5d   : > { %s1667_s2 = scalar_lea.vmem %s1666_s1, 256  ;;  %p1668_p7 = scmp.lt.s32.totalorder %s287_s15, %s1666_s1 }
  0x5e   : > { %p1663_p0 = pnand %p1661_p1, %p1649_p2  ;;  %p1669_p5 = scmp.lt.s32.totalorder %s1667_s2, %s1660_s11 }
  0x60   : > { %p1664_p13 = pneg %p1663_p0  ;;  %p1670_p6 = por %p1669_p5, %p1668_p7 }
  0x62   : > { %p1671_p3 = pnand %p1670_p6, %p1664_p13 }
  0x64   : > { %1674 = shalt.err (!%p1671_p3)
}
  0x65   : > { %1397 = dma.hbm_to_vmem [thread:$0]  (!%p1924_p4), %s1920_s13, 128, %s287_s15, %s276_s18  }
  0x66   : > { %p2072_p8 = scmp.ne.s32.totalorder %s2063_s8, 0 }
  0x67   : > { %s1945_s19 = sand.u32 (!%p2072_p8), 1, %s1739_s25   ;;  %p2073_p1 = scmp.ne.s32.totalorder (!%p2072_p8), %s2068_s21, 0 }
  0x68   : > { %295 = sbr.rel (%p2072_p8) target bundleno = 910 (0x38e), region = 48  ;;  %s1242_s9 = sshll.u32 (!%p2072_p8), %s1945_s19, 3 }
  0x69   : > { %s298_s1 = scalar_lea.sflag (!%p2072_p8), [#allocation3], %s1945_s19  ;;  %s1951_s2 = scalar_lea.vmem (!%p2072_p8), [#allocation2], %s1242_s9 }
  0x6d   : > { %1718 = dma.done.wait (%p2073_p1), %s298_s1, 128  }
  0x6e   : > { %1720 = vsyncadd (%p2073_p1), %s298_s1, 4294967168  ;;  %p2074_p3 = scmp.eq.s32.totalorder %s1821_s30, 0 }
  0x70   : > { %1722 = dma.done.wait (%p2074_p3), [#allocation6], 4160   ;;  %p2075_p6 = pmov %p2074_p3 }
  0x71   : > { %p2076_p13 = pmov %p2074_p3 }
  0x72   : > { %1724 = vsyncadd (%p2075_p6), [#allocation6], 4294963136 }
  0x73   : > { %1726 = dma.done.wait (%p2076_p13), [#allocation9], 4160   ;;  %p2077_p0 = pmov %p2074_p3 }
  0x74   : > { %v1758_v0 = vmov 0   ;;  %v1453_v1 = vld [vmem:[#allocation5 + $0xe4] ss:$16 sps:$4 sm:$0xff]   ;;  %v1455_v2 = vld [vmem:[#allocation5 + $0xec] ss:$16 sps:$4 sm:$0xff]   ;;  %v385_v35 = vlaneseq  ;;  %s1314_s16 = sshll.u32 %s1821_s30, 7 }
  0x75   : > { %1728 = vsyncadd (%p2077_p0), [#allocation9], 4294963136  ;;  %597 = vmatprep.mubr.bf16.mxu0 %v1758_v0  ;;  %638 = vmatprep.mubr.bf16.mxu1 %v1758_v0  ;;  %v1457_v3 = vld [vmem:[#allocation5 + $0xe0] ss:$16 sps:$4 sm:$0xff]   ;;  %v1458_v4 = vld [vmem:[#allocation5 + $0xe8] ss:$16 sps:$4 sm:$0xff]   ;;  %s1122_s14 = scalar_lea.hbm %s2056_s7, %s1314_s16 }
  0x76   : > { %565 = vmatprep.subr.bf16.mxu0 %v1453_v1  ;;  %606 = vmatprep.subr.bf16.mxu1 %v1455_v2  ;;  %v1459_v5 = vld [vmem:[#allocation5 + $0xc4] ss:$16 sps:$4 sm:$0xff]   ;;  %v1461_v6 = vld [vmem:[#allocation5 + $0xcc] ss:$16 sps:$4 sm:$0xff]   ;;  %v1463_v7 = vld [vmem:[#allocation5 + $0xc0] ss:$16 sps:$4 sm:$0xff]  }
  0x77   : > { %566 = vmatpush1.bf16.msra.mxu0 %v1457_v3  ;;  %607 = vmatpush1.bf16.msra.mxu1 %v1458_v4  ;;  %v1464_v8 = vld [vmem:[#allocation5 + $0xc8] ss:$16 sps:$4 sm:$0xff]   ;;  %v1465_v9 = vld [vmem:[#allocation5 + $0xa4] ss:$16 sps:$4 sm:$0xff]   ;;  %v1467_v10 = vld [vmem:[#allocation5 + $0xac] ss:$16 sps:$4 sm:$0xff]  }
  0x78   : > { %567 = vmatprep.subr.bf16.mxu0 %v1459_v5  ;;  %608 = vmatprep.subr.bf16.mxu1 %v1461_v6  ;;  %v1469_v11 = vld [vmem:[#allocation5 + $0xa0] ss:$16 sps:$4 sm:$0xff]   ;;  %v1470_v12 = vld [vmem:[#allocation5 + $0xa8] ss:$16 sps:$4 sm:$0xff]   ;;  %v1471_v13 = vld [vmem:[#allocation5 + $0x84] ss:$16 sps:$4 sm:$0xff]  }
  0x79   : > { %v1473_v14 = vld [vmem:[#allocation5 + $0x8c] ss:$16 sps:$4 sm:$0xff]   ;;  %v1475_v15 = vld [vmem:[#allocation5 + $0x80] ss:$16 sps:$4 sm:$0xff]   ;;  %v1476_v16 = vld [vmem:[#allocation5 + $0x88] ss:$16 sps:$4 sm:$0xff]  }
  0x7a   : > { %v1477_v17 = vld [vmem:[#allocation5 + $0x64] ss:$16 sps:$4 sm:$0xff]   ;;  %v1479_v18 = vld [vmem:[#allocation5 + $0x6c] ss:$16 sps:$4 sm:$0xff]   ;;  %v1481_v19 = vld [vmem:[#allocation5 + $0x60] ss:$16 sps:$4 sm:$0xff]  }
  0x7b   : > { %568 = vmatpush1.bf16.msra.mxu0 %v1463_v7  ;;  %609 = vmatpush1.bf16.msra.mxu1 %v1464_v8  ;;  %v1482_v20 = vld [vmem:[#allocation5 + $0x68] ss:$16 sps:$4 sm:$0xff]   ;;  %v1483_v21 = vld [vmem:[#allocation5 + $0x44] ss:$16 sps:$4 sm:$0xff]   ;;  %v1485_v22 = vld [vmem:[#allocation5 + $0x4c] ss:$16 sps:$4 sm:$0xff]  }
  0x7c   : > { %569 = vmatprep.subr.bf16.mxu0 %v1465_v9  ;;  %610 = vmatprep.subr.bf16.mxu1 %v1467_v10  ;;  %v1487_v23 = vld [vmem:[#allocation5 + $0x40] ss:$16 sps:$4 sm:$0xff]   ;;  %v1488_v24 = vld [vmem:[#allocation5 + $0x48] ss:$16 sps:$4 sm:$0xff]   ;;  %v1489_v25 = vld [vmem:[#allocation5 + $0x24] ss:$16 sps:$4 sm:$0xff]  }
  0x7d   : > { %v1491_v26 = vld [vmem:[#allocation5 + $0x2c] ss:$16 sps:$4 sm:$0xff]   ;;  %v1493_v27 = vld [vmem:[#allocation5 + $0x20] ss:$16 sps:$4 sm:$0xff]   ;;  %v1494_v28 = vld [vmem:[#allocation5 + $0x28] ss:$16 sps:$4 sm:$0xff]  }
  0x7e   : > { %v1495_v29 = vld [vmem:[#allocation5 + $0x4] ss:$16 sps:$4 sm:$0xff]   ;;  %v1497_v30 = vld [vmem:[#allocation5 + $0xc] ss:$16 sps:$4 sm:$0xff]   ;;  %v1499_v31 = vld [vmem:[#allocation5] ss:$16 sps:$4 sm:$0xff]  }
  0x7f   : > { %570 = vmatpush1.bf16.msra.mxu0 %v1469_v11  ;;  %611 = vmatpush1.bf16.msra.mxu1 %v1470_v12  ;;  %v1500_v32 = vld [vmem:[#allocation5 + $0x8] ss:$16 sps:$4 sm:$0xff]   ;;  %v386_v36 = vshrl.u32 %v385_v35, 7  ;;  %v383_v39 = vld [vmem:[#allocation7] sm:$0xf]  ;;  %s347_s18 = scalar_lea.vmem [#allocation11], %s1242_s9 }
  0x80   : > { %571 = vmatprep.subr.bf16.mxu0 %v1471_v13  ;;  %612 = vmatprep.subr.bf16.mxu1 %v1473_v14  ;;  %v349_v33 = vld [vmem:[%s1951_s2] sm:$0xff]  ;;  %v1503_v35 = vld [vmem:[#allocation10 + $0x38] sm:$0xff]   ;;  %s1124_s10 = sshll.u32 %s347_s18, 4  ;;  %s1111_s11 = scalar_lea.sflag [#allocation4], %s1945_s19  ;;  %s1125_s10 = int_to_ptr.vmem [resolvable:$true] %s1124_s10 }
  0x81   : > { %v350_v34 = vpack.c.bf16 %v349_v33, %v349_v33  ;;  %v1966_v37 = vsub.s32 0, %v386_v36  ;;  %v1968_v38 = vsub.s32 2, %v386_v36  ;;  %v1970_v40 = vsub.s32 1, %v386_v36  ;;  %v1501_v33 = vld [vmem:[#allocation10 + $0x78] sm:$0xff]   ;;  %s1675_s22 = scalar_lea.vmem %s1125_s10, 128  ;;  %p2078_p2 = scmp.ne.s32.totalorder %s2069_s23, 0 }
  0x82   : > { %v1972_v41 = vsub.s32 3, %v386_v36  ;;  %v1504_v36 = vld [vmem:[#allocation10 + $0xb8] sm:$0xff]   ;;  %p1676_p4 = scmp.ne.s32.totalorder %s1125_s10, %s1675_s22  ;;  %s1759_s30 = smov [#allocation11]  }
  0x83   : > { %572 = vmatpush1.bf16.msra.mxu0 %v1475_v15  ;;  %613 = vmatpush1.bf16.msra.mxu1 %v1476_v16  ;;  %v388_v42 = vrot.slane %v383_v39, %v1966_v37  ;;  %v396_v43 = vrot.slane %v383_v39, %v1968_v38  ;;  %v392_v44 = vrot.slane %v383_v39, %v1970_v40  ;;  %s1679_s9 = sshll.u32 %s1759_s30, 4  ;;  %s1680_s9 = int_to_ptr.vmem [resolvable:$false] %s1679_s9 }
  0x84   : > { %573 = vmatprep.subr.bf16.mxu0 %v1477_v17  ;;  %614 = vmatprep.subr.bf16.mxu1 %v1479_v18  ;;  %v400_v45 = vrot.slane %v383_v39, %v1972_v41  ;;  %v1505_v39 = vld [vmem:[#allocation10 + $0x70] sm:$0xff]   ;;  %p1677_p11 = pnand %p1676_p4, %p2078_p2  ;;  %s1681_s1 = scalar_lea.vmem %s1680_s9, 256 }
  0x85   : > { %p1682_p10 = scmp.lt.s32.totalorder %s1125_s10, %s1680_s9  ;;  %p1683_p12 = scmp.lt.s32.totalorder %s1681_s1, %s1675_s22 }
  0x86   : > { %p1678_p9 = pneg %p1677_p11 }
  0x87   : > { %574 = vmatpush1.bf16.msra.mxu0 %v1481_v19  ;;  %615 = vmatpush1.bf16.msra.mxu1 %v1482_v20  ;;  %p1684_p7 = por %p1683_p12, %p1682_p10 }
  0x88   : > { %575 = vmatprep.subr.bf16.mxu0 %v1483_v21  ;;  %616 = vmatprep.subr.bf16.mxu1 %v1485_v22 }
  0x89   : > { %p1685_p5 = pnand %p1684_p7, %p1678_p9 }
  0x8b   : > { %576 = vmatpush1.bf16.msra.mxu0 %v1487_v23  ;;  %617 = vmatpush1.bf16.msra.mxu1 %v1488_v24 }
  0x8c   : > { %577 = vmatprep.subr.bf16.mxu0 %v1489_v25  ;;  %618 = vmatprep.subr.bf16.mxu1 %v1491_v26 }
  0x8f   : > { %578 = vmatpush1.bf16.msra.mxu0 %v1493_v27  ;;  %619 = vmatpush1.bf16.msra.mxu1 %v1494_v28 }
  0x90   : > { %579 = vmatprep.subr.bf16.mxu0 %v1495_v29  ;;  %620 = vmatprep.subr.bf16.mxu1 %v1497_v30 }
  0x93   : > { %580 = vmatpush1.bf16.msra.mxu0 %v1499_v31  ;;  %621 = vmatpush1.bf16.msra.mxu1 %v1500_v32 }
  0x94   : > { %1317 = vmatprep.subr.bf16.mxu0 %v1501_v33 }
  0x96   : > { %598 = vmatmul.mubr.bf16.vlgmr.msra.gmra.mxu0 %v350_v34  ;;  %639 = vmatmul.mubr.bf16.vlgmr.msra.gmra.mxu1 %v350_v34  ;;  %v1502_v34 = vld [vmem:[#allocation10 + $0xf8] sm:$0xff]  }
  0x97   : > { %1339 = vmatprep.subr.bf16.mxu1 %v1502_v34  ;;  %1318 = vmatpush3.bf16.msra.mxu0 %v1503_v35 }
  0x98   : > { %1340 = vmatpush3.bf16.msra.mxu1 %v1504_v36  ;;  %1319 = vmatprep.subr.bf16.mxu0 %v1505_v39 }
 0x156   : > { %v599_v46 = vpop.f32.mrf.mxu0  ;;  %v640_v47 = vpop.f32.mrf.mxu1 }
 0x157   : > { %v600_v48 = vadd.f32 %v599_v46, %v388_v42  ;;  %v641_v49 = vadd.f32 %v640_v47, %v396_v43  ;;  %v1506_v42 = vld [vmem:[#allocation10 + $0xf0] sm:$0xff]  }
 0x158   : > { %v601_v50 = vpop.f32.mrf.mxu0  ;;  %v642_v51 = vpop.f32.mrf.mxu1  ;;  %1341 = vmatprep.subr.bf16.mxu1 %v1506_v42 }
 0x159   : > { %v651_v52 = vmul.f32 0.044715, %v600_v48  ;;  %v653_v53 = vmul.f32 0.044715, %v641_v49  ;;  %v602_v54 = vadd.f32 %v601_v50, %v392_v44  ;;  %v643_v55 = vadd.f32 %v642_v51, %v400_v45 }
 0x15a   : > { %v603_v56 = vpop.f32.mrf.mxu0  ;;  %v644_v57 = vpop.f32.mrf.mxu1  ;;  %v647_v19 = vmul.f32 0.5, %v600_v48  ;;  %v649_v23 = vmul.f32 0.5, %v641_v49 }
 0x15b   : > { %v655_v58 = vmul.f32 %v651_v52, %v600_v48  ;;  %v657_v59 = vmul.f32 %v653_v53, %v641_v49  ;;  %v652_v60 = vmul.f32 0.044715, %v602_v54  ;;  %v654_v61 = vmul.f32 0.044715, %v643_v55  ;;  %v1507_v56 = vld [vmem:[#allocation10 + $0x30] sm:$0xff]  }
 0x15c   : > { %v604_v62 = vpop.f32.mrf.mxu0  ;;  %v645_v63 = vpop.f32.mrf.mxu1  ;;  %v648_v20 = vmul.f32 0.5, %v602_v54  ;;  %v650_v27 = vmul.f32 0.5, %v643_v55  ;;  %v1508_v57 = vld [vmem:[#allocation10 + $0xb0] sm:$0xff]   ;;  %1320 = vmatpush3.bf16.msra.mxu0 %v1507_v56 }
 0x15d   : > { %v659_v0 = vmul.f32 %v655_v58, %v600_v48  ;;  %v656_v1 = vmul.f32 %v652_v60, %v602_v54  ;;  %v658_v2 = vmul.f32 %v654_v61, %v643_v55  ;;  %v661_v3 = vmul.f32 %v657_v59, %v641_v49  ;;  %1342 = vmatpush3.bf16.msra.mxu1 %v1508_v57  ;;  %v1509_v58 = vld [vmem:[#allocation10 + $0x68] sm:$0xff]   ;;  %v1513_v62 = vld [vmem:[#allocation10 + $0x60] sm:$0xff]  }
 0x15e   : > { %v1510_v59 = vld [vmem:[#allocation10 + $0xe8] sm:$0xff]   ;;  %1321 = vmatprep.subr.bf16.mxu0 %v1509_v58  ;;  %v1514_v63 = vld [vmem:[#allocation10 + $0xe0] sm:$0xff]  }
 0x15f   : > { %v660_v4 = vmul.f32 %v656_v1, %v602_v54  ;;  %v662_v5 = vmul.f32 %v658_v2, %v643_v55  ;;  %v663_v6 = vadd.f32 %v659_v0, %v600_v48  ;;  %v665_v7 = vadd.f32 %v661_v3, %v641_v49  ;;  %v1511_v60 = vld [vmem:[#allocation10 + $0x28] sm:$0xff]   ;;  %1343 = vmatprep.subr.bf16.mxu1 %v1510_v59  ;;  %v1515_v0 = vld [vmem:[#allocation10 + $0x20] sm:$0xff]   ;;  %v1517_v2 = vld [vmem:[#allocation10 + $0x58] sm:$0xff]  }
 0x160   : > { %v1512_v61 = vld [vmem:[#allocation10 + $0xa8] sm:$0xff]   ;;  %1322 = vmatpush3.bf16.msra.mxu0 %v1511_v60  ;;  %v1516_v1 = vld [vmem:[#allocation10 + $0xa0] sm:$0xff]   ;;  %v1518_v3 = vld [vmem:[#allocation10 + $0xd8] sm:$0xff]  }
 0x161   : > { %v664_v8 = vadd.f32 %v660_v4, %v602_v54  ;;  %v666_v9 = vadd.f32 %v662_v5, %v643_v55  ;;  %v667_v10 = vmul.f32 0.7978846, %v663_v6  ;;  %v669_v11 = vmul.f32 0.7978846, %v665_v7  ;;  %1344 = vmatpush3.bf16.msra.mxu1 %v1512_v61  ;;  %1323 = vmatprep.subr.bf16.mxu0 %v1513_v62  ;;  %v1519_v4 = vld [vmem:[#allocation10 + $0x18] sm:$0xff]   ;;  %v1521_v6 = vld [vmem:[#allocation10 + $0x50] sm:$0xff]  }
 0x162   : > { %1345 = vmatprep.subr.bf16.mxu1 %v1514_v63  ;;  %v1520_v5 = vld [vmem:[#allocation10 + $0x98] sm:$0xff]   ;;  %v1522_v7 = vld [vmem:[#allocation10 + $0xd0] sm:$0xff]  }
 0x163   : > { %v668_v12 = vmul.f32 0.7978846, %v664_v8  ;;  %v670_v13 = vmul.f32 0.7978846, %v666_v9  ;;  %1533 = vtanh.f32 %v667_v10  ;;  %v1523_v8 = vld [vmem:[#allocation10 + $0x10] sm:$0xff]   ;;  %v1525_v10 = vld [vmem:[#allocation10 + $0x48] sm:$0xff]  }
 0x164   : > { %1535 = vtanh.f32 %v669_v11  ;;  %1324 = vmatpush3.bf16.msra.mxu0 %v1515_v0  ;;  %v1524_v9 = vld [vmem:[#allocation10 + $0x90] sm:$0xff]   ;;  %v1526_v11 = vld [vmem:[#allocation10 + $0xc8] sm:$0xff]  }
 0x165   : > { %1537 = vtanh.f32 %v668_v12  ;;  %1346 = vmatpush3.bf16.msra.mxu1 %v1516_v1  ;;  %1325 = vmatprep.subr.bf16.mxu0 %v1517_v2  ;;  %v1527_v12 = vld [vmem:[#allocation10 + $0x8] sm:$0xff]  }
 0x166   : > { %1539 = vtanh.f32 %v670_v13  ;;  %1347 = vmatprep.subr.bf16.mxu1 %v1518_v3  ;;  %v1528_v13 = vld [vmem:[#allocation10 + $0x88] sm:$0xff]  }
 0x168   : > { %1326 = vmatpush3.bf16.msra.mxu0 %v1519_v4 }
 0x169   : > { %1348 = vmatpush3.bf16.msra.mxu1 %v1520_v5  ;;  %1327 = vmatprep.subr.bf16.mxu0 %v1521_v6 }
 0x16a   : > { %1349 = vmatprep.subr.bf16.mxu1 %v1522_v7 }
 0x16c   : > { %1328 = vmatpush3.bf16.msra.mxu0 %v1523_v8 }
 0x16d   : > { %1350 = vmatpush3.bf16.msra.mxu1 %v1524_v9  ;;  %1329 = vmatprep.subr.bf16.mxu0 %v1525_v10 }
 0x16e   : > { %1351 = vmatprep.subr.bf16.mxu1 %v1526_v11 }
 0x170   : > { %v1534_v14 = vpop.eup %1533  ;;  %1330 = vmatpush3.bf16.msra.mxu0 %v1527_v12 }
 0x171   : > { %v1536_v15 = vpop.eup %1535  ;;  %v675_v16 = vadd.f32 1.0, %v1534_v14  ;;  %v1529_v14 = vld [vmem:[#allocation10 + $0x40] sm:$0xff]   ;;  %1352 = vmatpush3.bf16.msra.mxu1 %v1528_v13 }
 0x172   : > { %v1538_v17 = vpop.eup %1537  ;;  %v677_v22 = vadd.f32 1.0, %v1536_v15  ;;  %v1530_v15 = vld [vmem:[#allocation10 + $0xc0] sm:$0xff]   ;;  %1331 = vmatprep.subr.bf16.mxu0 %v1529_v14 }
 0x173   : > { %v1540_v18 = vpop.eup %1539  ;;  %v676_v21 = vadd.f32 1.0, %v1538_v17  ;;  %v679_v25 = vmul.f32 %v675_v16, %v647_v19  ;;  %v1531_v16 = vld [vmem:[#allocation10] sm:$0xff]   ;;  %1353 = vmatprep.subr.bf16.mxu1 %v1530_v15 }
 0x174   : > { %v678_v24 = vadd.f32 1.0, %v1540_v18  ;;  %v681_v28 = vmul.f32 %v677_v22, %v649_v23  ;;  %v1532_v17 = vld [vmem:[#allocation10 + $0x80] sm:$0xff]   ;;  %1332 = vmatpush3.bf16.msra.mxu0 %v1531_v16 }
 0x175   : > { %v680_v26 = vmul.f32 %v676_v21, %v648_v20  ;;  %1354 = vmatpush3.bf16.msra.mxu1 %v1532_v17  ;;  %v706_v21 = vld [vmem:[%s2052_s3] sm:$0xf] }
 0x176   : > { %v682_v30 = vmul.f32 %v678_v24, %v650_v27  ;;  %v711_v22 = vrot.slane %v706_v21, %v1966_v37  ;;  %v719_v23 = vrot.slane %v706_v21, %v1968_v38  ;;  %v715_v24 = vrot.slane %v706_v21, %v1970_v40 }
 0x177   : > { %v683_v29 = vadd.f32 %v680_v26, %v679_v25 }
 0x179   : > { %v684_v31 = vadd.f32 %v683_v29, %v681_v28 }
 0x17b   : > { %v685_v32 = vadd.f32 %v684_v31, %v682_v30 }
 0x17d   : > { %686 = vadd.xlane.f32.xlu0 %v685_v32 }
 0x206   : > { %v687_v43 = vpop.xlane.xlu0 %686 }
 0x207   : > { %v689_v44 = vmul.f32 0.001953125, %v687_v43 }
 0x209   : > { %v1978_v45 = vsub.f32 %v679_v25, %v689_v44  ;;  %v1980_v46 = vsub.f32 %v680_v26, %v689_v44  ;;  %v1982_v47 = vsub.f32 %v681_v28, %v689_v44  ;;  %v1984_v48 = vsub.f32 %v682_v30, %v689_v44  ;;  %v736_v25 = vld [vmem:[#allocation8] sm:$0xf] }
 0x20a   : > { %v723_v26 = vrot.slane %v706_v21, %v1972_v41  ;;  %v745_v28 = vrot.slane %v736_v25, %v1970_v40  ;;  %v753_v29 = vrot.slane %v736_v25, %v1972_v41  ;;  %v741_v30 = vrot.slane %v736_v25, %v1966_v37 }
 0x20b   : > { %v694_v49 = vmul.f32 %v1978_v45, %v1978_v45  ;;  %v695_v50 = vmul.f32 %v1980_v46, %v1980_v46  ;;  %v696_v51 = vmul.f32 %v1982_v47, %v1982_v47  ;;  %v697_v53 = vmul.f32 %v1984_v48, %v1984_v48 }
 0x20c   : > { %v749_v31 = vrot.slane %v736_v25, %v1968_v38 }
 0x20d   : > { %v698_v52 = vadd.f32 %v695_v50, %v694_v49 }
 0x20f   : > { %v699_v54 = vadd.f32 %v698_v52, %v696_v51 }
 0x211   : > { %v700_v55 = vadd.f32 %v699_v54, %v697_v53 }
 0x213   : > { %701 = vadd.xlane.f32.xlu0 %v700_v55 }
 0x29c   : > { %v702_v18 = vpop.xlane.xlu0 %701 }
 0x29d   : > { %v703_v19 = vmul.f32 0.001953125, %v702_v18 }
 0x29f   : > { %v704_v20 = vadd.f32 1e-05, %v703_v19 }
 0x2a1   : > { %1541 = vrsqrt.f32 %v704_v20 }
 0x2ae   : > { %v1542_v27 = vpop.eup %1541 }
 0x2af   : > { %v729_v32 = vmul.f32 %v1542_v27, %v715_v24  ;;  %v731_v33 = vmul.f32 %v1542_v27, %v723_v26  ;;  %v728_v34 = vmul.f32 %v1542_v27, %v711_v22  ;;  %v730_v35 = vmul.f32 %v1542_v27, %v719_v23 }
 0x2b1   : > { %v733_v36 = vmul.f32 %v729_v32, %v1980_v46  ;;  %v735_v39 = vmul.f32 %v731_v33, %v1984_v48  ;;  %v732_v42 = vmul.f32 %v728_v34, %v1978_v45  ;;  %v734_v43 = vmul.f32 %v730_v35, %v1982_v47  ;;  %v1280_v45 = vld [vmem:[%s2055_s6] ss:$0 sm:$0xff] }
 0x2b3   : > { %v759_v44 = vadd.f32 %v745_v28, %v733_v36  ;;  %v761_v40 = vadd.f32 %v753_v29, %v735_v39  ;;  %v758_v49 = vadd.f32 %v741_v30, %v732_v42  ;;  %v760_v41 = vadd.f32 %v749_v31, %v734_v43 }
 0x2b5   : > { %v763_v50 = vpack.c.bf16 %v759_v44, %v759_v44  ;;  %v765_v37 = vpack.c.bf16 %v761_v40, %v761_v40  ;;  %v762_v38 = vpack.c.bf16 %v758_v49, %v758_v49  ;;  %v764_v51 = vpack.c.bf16 %v760_v41, %v760_v41 }
 0x2b7   : > { %1061 = vmatprep.mubr.bf16.mxu0 %v763_v50  ;;  %1101 = vmatprep.mubr.bf16.mxu1 %v765_v37 }
 0x2b8   : > { %1062 = vmatmul.mubr.bf16.vlgmr.msra.gmra.mxu0 %v762_v38  ;;  %1102 = vmatmul.mubr.bf16.vlgmr.msra.gmra.mxu1 %v764_v51 }
 0x378   : > { %v1333_v46 = vpop.f32.mrf.mxu0  ;;  %v1355_v48 = vpop.f32.mrf.mxu1 }
 0x37a   : > { %v1334_v47 = vpop.f32.mrf.mxu0  ;;  %v1356_v52 = vpop.f32.mrf.mxu1 }
 0x37b   : > { %v1335_v53 = vadd.f32 %v1334_v47, %v1333_v46  ;;  %v1357_v57 = vadd.f32 %v1356_v52, %v1355_v48 }
 0x37c   : > { %v1336_v54 = vpop.f32.mrf.mxu0  ;;  %v1358_v55 = vpop.f32.mrf.mxu1 }
 0x37d   : > { %v1064_v56 = vadd.f32 %v1335_v53, %v1280_v45 }
 0x37e   : > { %v1337_v58 = vpop.f32.mrf.mxu0  ;;  %v1359_v59 = vpop.f32.mrf.mxu1 }
 0x37f   : > { %v1104_v60 = vadd.f32 %v1357_v57, %v1064_v56 }
 0x381   : > { %1109 = vst [vmem:[%s347_s18] sm:$0xff] %v1104_v60 }
 0x382   : > { %1688 = shalt.err (!%p1685_p5)
}
 0x383   : > { %s1689_s2 = scalar_lea.hbm %s1122_s14, 128  ;;  %s1693_s21 = scalar_lea.hbm %s2056_s7, 256 }
 0x384   : > { %p1690_p8 = scmp.ne.s32.totalorder %s1122_s14, %s1689_s2  ;;  %p1694_p6 = scmp.lt.s32.totalorder %s1122_s14, %s2056_s7 }
 0x385   : > { %p1695_p13 = scmp.lt.s32.totalorder %s1693_s21, %s1689_s2 }
 0x386   : > { %p1691_p1 = pnand %p1690_p8, %p2078_p2 }
 0x387   : > { %p1696_p0 = por %p1695_p13, %p1694_p6 }
 0x388   : > { %p1692_p3 = pneg %p1691_p1 }
 0x38a   : > { %p1697_p4 = pnand %p1696_p0, %p1692_p3 }
 0x38c   : > { %1700 = shalt.err (!%p1697_p4)
}
 0x38d   : > { %1379 = dma.vmem_to_hbm [thread:$0]  (%p2078_p2), %s1125_s10, 128, %s1122_s14, %s1111_s11  }
 0x38e PF: > { %s1136_s16 = sand.u32 1, %s1735_s24   ;;  %p2079_p11 = scmp.ne.s32.totalorder %s2070_s28, 0 }
 0x38f   : > { %p2080_p9 = scmp.ge.s32.totalorder %s1747_s27, 2  ;;  %s1137_s18 = scalar_lea.sflag [#allocation4], %s1136_s16 }
 0x391   : > { %p1399_p10 = pnand %p2080_p9, %p2079_p11 }
 0x393   : > { %p1400_p12 = pneg %p1399_p10 }
 0x395   : > { %1730 = dma.done.wait (%p1400_p12), %s1137_s18, 128  }
 0x396   : > { %1732 = vsyncadd (%p1400_p12), %s1137_s18, 4294967168  ;;  %p22_p7 = scmp.ge.s32.totalorder %s1882_s17, 4   ;;  %s2081_s24 = smov %s1739_s25 }
 0x397   : > { %s2082_s25 = smov %s1743_s26  ;;  %s2083_s26 = smov %s1893_s20 }
 0x398   : > { %s2084_s27 = smov %s1882_s17  ;;  %24 = sbr.rel (!%p22_p7) target bundleno = 10 (0xa), region = 109 }
 0x39d   :  { %1142 = vsyncpa [#allocation3], 1 }
 0x39e   :  { %1144 = vsyncpa [#allocation3 + $0x1], 1 }
 0x39f   :  { %1145 = vsyncpa [#allocation6], 1 }
 0x3a0   :  { %1146 = vsyncpa [#allocation9], 1 }
 0x3a1   :  { %1147 = vsyncpa [#allocation4], 1 }
 0x3a2   :  { %1149 = vsyncpa [#allocation4 + $0x1], 1 }

</bundles_post_ra>
